<compile_context>
chip_gen: v7x
topology: tpu7x:2x2x1
jax: 0.10.0
libtpu: 0.0.40
codegen_flags: <defaults>
</compile_context>

<pallas_src>
import functools

import jax
import jax.numpy as jnp
from jax.experimental import pallas as pl
from jax.experimental.pallas import tpu as pltpu

_LN10 = 2.302585092994046  # ln(10); log10(v) = ln(v) / ln(10)


def _logabs_kernel(x_ref, o_ref):
    # Compute in f32 in-register regardless of storage dtype (v5e has no bf16
    # VPU/EUP; the cast is free relative to the memory bound), store back in
    # the output's native dtype.  Single log() = one EUP push per element.
    x = x_ref[...].astype(jnp.float32)
    y = jnp.log(jnp.abs(x) + 1.0) * (1.0 / _LN10)
    o_ref[...] = y.astype(o_ref.dtype)


def _round_up(n, m):
    return ((n + m - 1) // m) * m


def _sublane_multiple(dtype):
    # Sub-32-bit dtypes pack along sublanes: a vreg holds 8 f32 rows,
    # 16 bf16 rows, 32 int8/fp8 rows.
    itemsize = jnp.dtype(dtype).itemsize
    return max(8, 8 * (4 // max(1, itemsize)))


@functools.lru_cache(maxsize=None)
def _chip_config():
    """Returns (pipeline_vmem_budget_bytes, vmem_limit_bytes_or_None, num_tc).

    The budget covers double-buffered input + output blocks (2 * (in + out)).
    """
    try:
        kind = jax.devices()[0].device_kind.lower()
    except Exception:
        kind = ""
    if "v7" in kind:
        # 2 TCs/chip, 64 MiB physical / 32 MiB default scoped VMEM:
        # 4 MiB f32 blocks -> 16 MiB total, fits default with headroom.
        return (16 << 20, None, 2)
    if "v6" in kind:
        # 1 TC, 128 MiB physical VMEM: 8 MiB f32 blocks (32 MiB total) and
        # raise the scoped limit past the 32 MiB default.
        return (32 << 20, 48 << 20, 1)
    if "v5e" in kind or "lite" in kind:
        # 1 TC, 16 MiB default scoped VMEM: 2 MiB blocks -> 8 MiB total.
        return (8 << 20, None, 1)
    if "v5" in kind or "v4" in kind:
        # v5p / v4 megacore (2 TCs), conservative budget.
        return (8 << 20, None, 2)
    return (8 << 20, None, 1)


def logabs(x):
    """Elementwise log10(abs(x) + 1) via a Pallas TPU kernel.

    Floating inputs keep their dtype end-to-end (values computed through an
    f32 round-trip in-register); integer inputs return float32.
    """
    orig_shape = x.shape
    in_dtype = x.dtype
    is_float = jnp.issubdtype(in_dtype, jnp.floating)
    final_dtype = in_dtype if is_float else jnp.float32

    n = x.size
    if n == 0:
        return jnp.zeros(orig_shape, final_dtype)

    flat = jnp.ravel(x)
    kern_in_dtype = in_dtype
    if jnp.dtype(in_dtype).itemsize > 4:
        # TODO(synk): 64-bit inputs (f64/i64) are computed through f32; TPU has
        # no native 64-bit VPU/EUP path.  Result is cast back to final_dtype.
        flat = flat.astype(jnp.float32)
        kern_in_dtype = jnp.dtype(jnp.float32)
    kern_out_dtype = kern_in_dtype if jnp.issubdtype(kern_in_dtype, jnp.floating) \
        else jnp.dtype(jnp.float32)

    # Lane-dense slab: widest last dim that divides n (larger unmasked stores).
    lanes = 128
    for cand in (1024, 512, 256):
        if n % cand == 0:
            lanes = cand
            break

    needs_pad = (n % lanes) != 0  # only possible when lanes == 128
    if needs_pad:
        # Rare path (non-lane-aligned element count): one extra pad pass; the
        # padded tail lanes compute garbage harmlessly and are sliced off.
        n_pad = _round_up(n, lanes)
        flat = jnp.pad(flat, (0, n_pad - n))
    else:
        n_pad = n
    rows = n_pad // lanes
    x2d = flat.reshape(rows, lanes)

    in_item = jnp.dtype(kern_in_dtype).itemsize
    out_item = jnp.dtype(kern_out_dtype).itemsize
    sub = max(_sublane_multiple(kern_in_dtype), _sublane_multiple(kern_out_dtype))

    # --- generation-aware tile selection --------------------------------
    budget, vmem_limit, num_tc = _chip_config()
    bytes_per_row = 2 * (in_item + out_item) * lanes  # double-buffered in+out
    cap = max(sub, (budget // bytes_per_row) // sub * sub)

    if rows <= cap:
        if num_tc >= 2 and rows >= 2 * sub:
            # Split in two only when there are two TensorCores to feed.
            tm = _round_up(pl.cdiv(rows, 2), sub)
        else:
            tm = rows  # single full-extent block; never force a split on 1-TC chips
    else:
        tm = cap
        if num_tc >= 2:
            # Nudge the block count even so the two TCs get balanced work.
            nblk = pl.cdiv(rows, tm)
            if nblk % 2:
                nblk += 1
            tm = max(sub, _round_up(pl.cdiv(rows, nblk), sub))

    grid = (pl.cdiv(rows, tm),)

    cp_kwargs = dict(dimension_semantics=("parallel",))
    if vmem_limit is not None and 2 * tm * lanes * (in_item + out_item) > (24 << 20):
        cp_kwargs["vmem_limit_bytes"] = vmem_limit
    compiler_params = pltpu.CompilerParams(**cp_kwargs)

    cost = pl.CostEstimate(
        flops=2 * n,
        transcendentals=n,
        bytes_accessed=n_pad * (in_item + out_item),
    )

    out2d = pl.pallas_call(
        _logabs_kernel,
        out_shape=jax.ShapeDtypeStruct((rows, lanes), kern_out_dtype),
        grid_spec=pltpu.PrefetchScalarGridSpec(
            num_scalar_prefetch=0,
            grid=grid,
            in_specs=[pl.BlockSpec((tm, lanes), lambda i: (i, 0))],
            out_specs=pl.BlockSpec((tm, lanes), lambda i: (i, 0)),
        ),
        compiler_params=compiler_params,
        cost_estimate=cost,
    )(x2d)

    out_flat = out2d.reshape(-1)
    if needs_pad:
        out_flat = out_flat[:n]
    out = out_flat.reshape(orig_shape)
    if out.dtype != final_dtype:
        out = out.astype(final_dtype)
    return out


if __name__ == "__main__":
    key = jax.random.PRNGKey(0)

    # SincNet-like activation: batch=2, channels=4, 16x16 -> 2048 elements,
    # lane-aligned (wide-slab path, no pad/slice).
    x = jax.random.normal(key, (2, 4, 16, 16), dtype=jnp.float32) * 3.0
    y = logabs(x)
    jax.block_until_ready(y)
    y_ref = jnp.log10(jnp.abs(x) + 1.0)
    assert y.shape == x.shape and y.dtype == x.dtype
    assert jnp.max(jnp.abs(y - y_ref)) < 1e-5

    # bf16 path: data stays bf16 in HBM, f32 cast happens in-register.
    xb = x.astype(jnp.bfloat16)
    yb = logabs(xb)
    jax.block_until_ready(yb)
    yb_ref = jnp.log10(jnp.abs(xb.astype(jnp.float32)) + 1.0)
    assert yb.dtype == jnp.bfloat16 and yb.shape == xb.shape
    assert jnp.max(jnp.abs(yb.astype(jnp.float32) - yb_ref)) < 2e-2

    # Unaligned size: exercises the (rare) pad + ragged-block path.
    xu = jax.random.normal(jax.random.PRNGKey(1), (3, 50), dtype=jnp.float32)
    yu = logabs(xu)
    jax.block_until_ready(yu)
    assert jnp.max(jnp.abs(yu - jnp.log10(jnp.abs(xu) + 1.0))) < 1e-5

    # Integer path: no wrapper-side cast pass, kernel casts in-register.
    xi = jax.random.randint(jax.random.PRNGKey(2), (2, 4, 8, 8), -50, 50, dtype=jnp.int32)
    yi = logabs(xi)
    jax.block_until_ready(yi)
    assert yi.dtype == jnp.float32
    assert jnp.max(jnp.abs(yi - jnp.log10(jnp.abs(xi.astype(jnp.float32)) + 1.0))) < 1e-5

    print("KERNEL_OK")
</pallas_src>

<mosaic_0001>
module attributes {stable_mosaic.version = 11 : i64} {
  func.func @_logabs_kernel(%arg0: i32, %arg1: memref<2x1024xf32, #tpu.memory_space<vmem>>, %arg2: memref<2x1024xf32, #tpu.memory_space<vmem>>) attributes {dimension_semantics = [#tpu.dimension_semantics<parallel>], iteration_bounds = array<i64: 1>, scalar_prefetch = 0 : i64, scratch_operands = 0 : i64, tpu.core_type = #tpu.core_type<tc>, window_params = [{transform_indices = @transform_0, window_bounds = array<i64: 2, 1024>}, {transform_indices = @transform_1, window_bounds = array<i64: 2, 1024>}]} {
    %c0 = arith.constant 0 : index
    %c0_0 = arith.constant 0 : index
    %0 = vector.load %arg1[%c0, %c0_0] : memref<2x1024xf32, #tpu.memory_space<vmem>>, vector<2x1024xf32>
    %1 = math.absf %0 : vector<2x1024xf32>
    %cst = arith.constant 1.000000e+00 : f32
    %2 = vector.broadcast %cst : f32 to vector<2x1024xf32>
    %3 = arith.addf %1, %2 : vector<2x1024xf32>
    %4 = math.log %3 : vector<2x1024xf32>
    %cst_1 = arith.constant 0.434294492 : f32
    %5 = vector.broadcast %cst_1 : f32 to vector<2x1024xf32>
    %6 = arith.mulf %4, %5 : vector<2x1024xf32>
    %c0_2 = arith.constant 0 : index
    %c0_3 = arith.constant 0 : index
    %7 = vector.load %arg2[%c0_2, %c0_3] : memref<2x1024xf32, #tpu.memory_space<vmem>>, vector<2x1024xf32>
    tpu.vector_store %arg2[%c0_2, %c0_3], %6 {strides = array<i32>} : memref<2x1024xf32, #tpu.memory_space<vmem>>, vector<2x1024xf32>,
    return
  }
  func.func @transform_0(%arg0: i32) -> (i32, i32) {
    %c0_i32 = arith.constant 0 : i32
    %c0_i32_0 = arith.constant 0 : i32
    return %arg0, %c0_i32 : i32, i32
  }
  func.func @transform_1(%arg0: i32) -> (i32, i32) {
    %c0_i32 = arith.constant 0 : i32
    %c0_i32_0 = arith.constant 0 : i32
    return %arg0, %c0_i32 : i32, i32
  }
}

</mosaic_0001>

<bundles_post_ra>
// kernel: tpu_custom_call.1
= control target key start
LH: loop header
LB: loop body
LE: loop exit
PB: predicated region body
PF: predicated region fallthrough
CT: control target
= control target key end

     0   :  { %6 = vsyncpa [#allocation3], 0  ;;  %s140_s0 = inlined_call_operand.hbm [shape: f32[2,1024], index: 0, kind: input, shape index: {}]   ;;  %s141_s1 = inlined_call_operand.hbm [shape: f32[2,1024], index: 1, kind: output, shape index: {}]  }
   0x1   :  { %7 = vsyncpa [#allocation4], 0  ;;  %s104_s6 = smov [#allocation2]   ;;  %s56_s10 = scalar_lea.hbm %s140_s0, 256 }
   0x2   :  { %s14_s7 = sshll.u32 %s104_s6, 4  ;;  %p57_p0 = scmp.ne.s32.totalorder %s140_s0, %s56_s10  ;;  %s15_s7 = int_to_ptr.vmem [resolvable:$true] %s14_s7 }
   0x3   :  { %p60_p1 = scmp.lt.u32.totalorder %s56_s10, %s140_s0 }
   0x5   :  { %p62_p2 = pnand %p60_p1, %p57_p0 }
   0x7   :  { %65 = shalt.err (!%p62_p2)
}
   0x8   :  { %s66_s15 = scalar_lea.vmem %s15_s7, 256  ;;  %p71_p4 = scmp.lt.s32.totalorder %s15_s7, %s15_s7 }
   0x9   :  { %p67_p3 = scmp.ne.s32.totalorder %s15_s7, %s66_s15  ;;  %p72_p5 = scmp.lt.s32.totalorder %s66_s15, %s66_s15 }
   0xb   :  { %p73_p6 = por %p72_p5, %p71_p4 }
   0xd   :  { %p74_p7 = pnand %p73_p6, %p67_p3 }
   0xf   :  { %77 = shalt.err (!%p74_p7)
}
  0x10   :  { %17 = dma.hbm_to_vmem [thread:$0]  %s140_s0, 256, %s15_s7, [#allocation3]  }
  0x11   :  { %100 = dma.done.wait [#allocation3], 256  }
  0x12   :  { %101 = vsyncadd [#allocation3], 4294967040  ;;  %v21_v0 = vld [vmem:[#allocation2] sm:$0xff]  ;;  %v22_v1 = vld [vmem:[#allocation2 + $0x8] sm:$0xff]  ;;  %s105_s18 = smov [#allocation5]  }
  0x13   :  { %v23_v2 = vand.u32 2147483647, %v21_v0  ;;  %v24_v3 = vand.u32 2147483647, %v22_v1  ;;  %s41_s19 = sshll.u32 %s105_s18, 4  ;;  %s42_s19 = int_to_ptr.vmem [resolvable:$true] %s41_s19 }
  0x14   :  { %s78_s0 = scalar_lea.vmem %s42_s19, 256  ;;  %p83_p9 = scmp.lt.s32.totalorder %s42_s19, %s42_s19 }
  0x15   :  { %v25_v4 = vadd.f32 1.0, %v23_v2  ;;  %v26_v5 = vadd.f32 1.0, %v24_v3  ;;  %p79_p8 = scmp.ne.s32.totalorder %s42_s19, %s78_s0  ;;  %p84_p10 = scmp.lt.s32.totalorder %s78_s0, %s78_s0 }
  0x17   :  { %52 = vlog2.f32 %v25_v4  ;;  %p85_p11 = por %p84_p10, %p83_p9 }
  0x18   :  { %54 = vlog2.f32 %v26_v5 }
  0x19   :  { %p86_p12 = pnand %p85_p11, %p79_p8 }
  0x21   :  { %v53_v6 = vpop.eup %52 }
  0x22   :  { %v55_v7 = vpop.eup %54  ;;  %v28_v8 = vmul.f32 0.6931472, %v53_v6 }
  0x23   :  { %v30_v9 = vmul.f32 0.6931472, %v55_v7 }
  0x24   :  { %v31_v10 = vmul.f32 0.4342945, %v28_v8 }
  0x25   :  { %v32_v11 = vmul.f32 0.4342945, %v30_v9 }
  0x26   :  { %33 = vst [vmem:[#allocation5] sm:$0xff] %v31_v10 }
  0x27   :  { %34 = vst [vmem:[#allocation5 + $0x8] sm:$0xff] %v32_v11 }
  0x28   :  { %89 = shalt.err (!%p86_p12)
}
  0x29   :  { %s90_s22 = scalar_lea.hbm %s141_s1, 256 }
  0x2a   :  { %p91_p13 = scmp.ne.s32.totalorder %s141_s1, %s90_s22  ;;  %p94_p0 = scmp.lt.u32.totalorder %s90_s22, %s141_s1 }
  0x2c   :  { %p96_p1 = pnand %p94_p0, %p91_p13 }
  0x2e   :  { %99 = shalt.err (!%p96_p1)
}
  0x2f   :  { %44 = dma.vmem_to_hbm [thread:$0]  %s42_s19, 256, %s141_s1, [#allocation4]  }
  0x30   :  { %102 = dma.done.wait [#allocation4], 256  }
  0x31   :  { %103 = vsyncadd [#allocation4], 4294967040 }
  0x32   :  { %48 = vsyncpa [#allocation3], 1 }
  0x33   :  { %49 = vsyncpa [#allocation4], 1 }

</bundles_post_ra>
